<compile_context>
chip_gen: v5e
topology: v5e:2x2
jax: 0.10.0
libtpu: 0.0.40
codegen_flags: <defaults>
</compile_context>

<pallas_src>
import jax
import jax.numpy as jnp
from jax.experimental import pallas as pl
from jax.experimental.pallas import tpu as pltpu


def _attention_pool_kernel(x_ref, o_ref, acc_ref):
    # x_ref  : (TB, TS, TH) input tile
    # o_ref  : (TB, TH)     pooled output tile (resident across the S grid axis)
    # acc_ref: (TB, TH)     f32 accumulator scratch
    @pl.when(pl.program_id(2) == 0)
    def _():
        acc_ref[...] = jnp.zeros_like(acc_ref)

    # Attention weights are identically 1.0 (softmax over a size-1 channel dim),
    # so the attention-weighted sum over the sequence is a plain sum over S.
    acc_ref[...] += jnp.sum(x_ref[...].astype(jnp.float32), axis=1)

    @pl.when(pl.program_id(2) == pl.num_programs(2) - 1)
    def _():
        o_ref[...] = acc_ref[...].astype(o_ref.dtype)


def _round_up(n, m):
    return ((n + m - 1) // m) * m


def _choose_tiles(B, S, H, itemsize, budget_bytes):
    """Pick (tb, ts, th) so the input block fits budget_bytes and padding is
    avoided whenever the full dim is a legal block extent."""
    sub = 16 if itemsize == 2 else 8

    # Batch tile: full batch if small (a full-dim block needs no alignment),
    # otherwise sublane-dense.
    tb = B if B <= sub else sub

    # Hidden tile: prefer the full hidden dim (no padding, one lane-dense slab);
    # fall back to a multiple of 128 if a minimal (tb, 8, H) slab is too big.
    if tb * 8 * H * itemsize <= budget_bytes:
        th = H
    else:
        th = max(128, (budget_bytes // (tb * 8 * itemsize)) // 128 * 128)

    # Sequence tile: whole sequence if it fits (single reduction step),
    # otherwise the largest multiple of 8 under the budget.
    ts_cap = max(8, (budget_bytes // (tb * th * itemsize)) // 8 * 8)
    ts = S if S <= ts_cap else ts_cap
    return tb, ts, th


def attention_pooling(x, conv_weight=None, conv_bias=None,
                      *, vmem_block_budget_bytes=8 * 1024 * 1024):
    """Forward pass of AttentionPooling. Returns (B, 1, H) == x.sum(1, keepdim=True).

    conv_weight / conv_bias are accepted for parity with the nn.Module's
    parameters but provably do not influence the result: Softmax(dim=1) over the
    conv's single output channel is identically 1.0, so the weighted sum over the
    sequence reduces exactly to a plain sum over dim 1.
    """
    del conv_weight, conv_bias  # cancel exactly (see module docstring above)
    B, S, H = x.shape
    itemsize = jnp.dtype(x.dtype).itemsize

    tb, ts, th = _choose_tiles(B, S, H, itemsize, vmem_block_budget_bytes)

    Bp = B if tb == B else _round_up(B, tb)
    Hp = H if th == H else _round_up(H, th)
    Sp = S if ts == S else _round_up(S, ts)

    # Zero-pad only when a tile does not evenly cover a dim (zeros are the
    # identity for the sum reduction).  For typical shapes this is a no-op, so
    # no extra HBM copy pass is paid.
    if (Bp, Sp, Hp) != (B, S, H):
        x = jnp.pad(x, ((0, Bp - B), (0, Sp - S), (0, Hp - H)))

    grid = (Bp // tb, Hp // th, Sp // ts)    # reduction axis (S) last

    out = pl.pallas_call(
        _attention_pool_kernel,
        out_shape=jax.ShapeDtypeStruct((Bp, Hp), x.dtype),
        grid=grid,
        in_specs=[pl.BlockSpec((tb, ts, th), lambda b, h, s: (b, s, h))],
        out_specs=pl.BlockSpec((tb, th), lambda b, h, s: (b, h)),
        scratch_shapes=[pltpu.VMEM((tb, th), jnp.float32)],
        compiler_params=pltpu.CompilerParams(
            dimension_semantics=("parallel", "parallel", "arbitrary"),
            vmem_limit_bytes=32 * 1024 * 1024,
        ),
    )(x)

    return out[:B, :H].reshape(B, 1, H)


if __name__ == "__main__":
    key = jax.random.PRNGKey(0)
    B, S, H = 2, 8, 32
    kx, kw, kb = jax.random.split(key, 3)
    x = jax.random.normal(kx, (B, S, H), dtype=jnp.float32)
    # nn.Conv1d(H, 1, kernel_size=1) parameters (mirror the module; they cancel).
    conv_w = jax.random.normal(kw, (H,), dtype=jnp.float32) * 0.1
    conv_b = jax.random.normal(kb, (), dtype=jnp.float32) * 0.1

    out = attention_pooling(x, conv_w, conv_b)
    out = jax.block_until_ready(out)

    # Reference mirroring the PyTorch forward exactly (conv -> softmax(dim=1)
    # -> multiply -> transpose -> sum keepdim).
    x_a = jnp.transpose(x, (0, 2, 1))                                   # (B, H, S)
    scores = jnp.einsum("h,bhs->bs", conv_w, x_a)[:, None, :] + conv_b  # (B, 1, S)
    attn = jax.nn.softmax(scores, axis=1)                               # size-1 dim -> all ones
    ref = jnp.sum(jnp.transpose(attn * x_a, (0, 2, 1)), axis=1, keepdims=True)

    assert out.shape == (B, 1, H), out.shape
    assert jnp.allclose(out, ref, atol=1e-5, rtol=1e-5), "mismatch vs reference"

    print("KERNEL_OK")
</pallas_src>

<mosaic_0001>
module attributes {stable_mosaic.version = 11 : i64} {
  func.func @_attention_pool_kernel(%arg0: i32, %arg1: i32, %arg2: i32, %arg3: memref<2x8x32xf32, #tpu.memory_space<vmem>>, %arg4: memref<2x32xf32, #tpu.memory_space<vmem>>, %arg5: memref<2x32xf32, #tpu.memory_space<vmem>>) attributes {dimension_semantics = [#tpu.dimension_semantics<parallel>, #tpu.dimension_semantics<parallel>, #tpu.dimension_semantics<arbitrary>], iteration_bounds = array<i64: 1, 1, 1>, scalar_prefetch = 0 : i64, scratch_operands = 1 : i64, tpu.core_type = #tpu.core_type<tc>, window_params = [{transform_indices = @transform_0, window_bounds = array<i64: 2, 8, 32>}, {transform_indices = @transform_1, window_bounds = array<i64: 2, 32>}]} {
    %c0_i32 = arith.constant 0 : i32
    %0 = arith.cmpi eq, %arg2, %c0_i32 : i32
    %1 = arith.extui %0 : i1 to i32
    %c0_i32_0 = arith.constant 0 : i32
    %2 = arith.cmpi ne, %1, %c0_i32_0 : i32
    scf.if %2 {
      %cst_9 = arith.constant 0.000000e+00 : f32
      %11 = vector.broadcast %cst_9 : f32 to vector<2x32xf32>
      %c0_10 = arith.constant 0 : index
      %c0_11 = arith.constant 0 : index
      %12 = vector.load %arg5[%c0_10, %c0_11] : memref<2x32xf32, #tpu.memory_space<vmem>>, vector<2x32xf32>
      tpu.vector_store %arg5[%c0_10, %c0_11], %11 {strides = array<i32>} : memref<2x32xf32, #tpu.memory_space<vmem>>, vector<2x32xf32>,
    } else {
    }
    %c0 = arith.constant 0 : index
    %c0_1 = arith.constant 0 : index
    %3 = vector.load %arg5[%c0, %c0_1] : memref<2x32xf32, #tpu.memory_space<vmem>>, vector<2x32xf32>
    %c0_2 = arith.constant 0 : index
    %c0_3 = arith.constant 0 : index
    %c0_4 = arith.constant 0 : index
    %4 = vector.load %arg3[%c0_2, %c0_3, %c0_4] : memref<2x8x32xf32, #tpu.memory_space<vmem>>, vector<2x8x32xf32>
    %cst = arith.constant dense<0.000000e+00> : vector<2x32xf32>
    %5 = vector.multi_reduction <add>, %4, %cst [1] : vector<2x8x32xf32> to vector<2x32xf32>
    %6 = arith.addf %3, %5 : vector<2x32xf32>
    %c0_5 = arith.constant 0 : index
    %c0_6 = arith.constant 0 : index
    %7 = vector.load %arg5[%c0_5, %c0_6] : memref<2x32xf32, #tpu.memory_space<vmem>>, vector<2x32xf32>
    tpu.vector_store %arg5[%c0_5, %c0_6], %6 {strides = array<i32>} : memref<2x32xf32, #tpu.memory_space<vmem>>, vector<2x32xf32>,
    %c0_i32_7 = arith.constant 0 : i32
    %8 = arith.cmpi eq, %arg2, %c0_i32_7 : i32
    %9 = arith.extui %8 : i1 to i32
    %c0_i32_8 = arith.constant 0 : i32
    %10 = arith.cmpi ne, %9, %c0_i32_8 : i32
    scf.if %10 {
      %c0_9 = arith.constant 0 : index
      %c0_10 = arith.constant 0 : index
      %11 = vector.load %arg5[%c0_9, %c0_10] : memref<2x32xf32, #tpu.memory_space<vmem>>, vector<2x32xf32>
      %c0_11 = arith.constant 0 : index
      %c0_12 = arith.constant 0 : index
      %12 = vector.load %arg4[%c0_11, %c0_12] : memref<2x32xf32, #tpu.memory_space<vmem>>, vector<2x32xf32>
      tpu.vector_store %arg4[%c0_11, %c0_12], %11 {strides = array<i32>} : memref<2x32xf32, #tpu.memory_space<vmem>>, vector<2x32xf32>,
    } else {
    }
    return
  }
  func.func @transform_0(%arg0: i32, %arg1: i32, %arg2: i32) -> (i32, i32, i32) {
    %c0_i32 = arith.constant 0 : i32
    return %arg0, %arg2, %arg1 : i32, i32, i32
  }
  func.func @transform_1(%arg0: i32, %arg1: i32, %arg2: i32) -> (i32, i32) {
    %c0_i32 = arith.constant 0 : i32
    return %arg0, %arg1 : i32, i32
  }
}

</mosaic_0001>

<bundles_post_ra>
// kernel: tpu_custom_call.1
= control target key start
LH: loop header
LB: loop body
LE: loop exit
PB: predicated region body
PF: predicated region fallthrough
CT: control target
= control target key end

     0   :  { %6 = vsyncpa [#allocation4], 0  ;;  %s160_s0 = inlined_call_operand.hbm [shape: f32[2,8,32], index: 0, kind: input, shape index: {}]   ;;  %s161_s1 = inlined_call_operand.hbm [shape: f32[2,32], index: 1, kind: output, shape index: {}]  }
   0x1   :  { %7 = vsyncpa [#allocation5], 0  ;;  %s12_s8 = sshll.u32 %s160_s0, 4  ;;  %s136_s9 = smov [#allocation3]   ;;  %s13_s8 = int_to_ptr.hbm [resolvable:$true] %s12_s8 }
   0x2   :  { %s14_s10 = sshll.u32 %s136_s9, 4  ;;  %s137_s11 = smov 128   ;;  %s15_s10 = int_to_ptr.vmem [resolvable:$true] %s14_s10 }
   0x3   :  { %s138_s12 = smov 8  }
   0x4   :  { %20 = dma.hbm_to_vmem [thread:$0]  %s13_s8, 256, %s15_s10, [#allocation4], %s137_s11, %s137_s11, %s138_s12  }
   0x5   :  { %132 = dma.done.wait [#allocation4], 256  }
   0x6   :  { %133 = vsyncadd [#allocation4], 4294967040  ;;  %vm29_vm0 = vcmask 254976   ;;  %v139_v0 = vmov 0.0   ;;  %vm34_vm1 = vcmask 261120   ;;  %v32_v1 = vld [vmem:[#allocation3] sm:$0xff] }
   0x7   :  { %30 = vst.msk [vmem:[#allocation2] sm:$0x3] %vm29_vm0, %v139_v0  ;;  %v33_v2 = vld [vmem:[#allocation3 + $0x8] sm:$0xff]  ;;  %v35_v3 = vsel %vm34_vm1, %v32_v1, 0.0  ;;  %vm51_vm2 = vcmask 1041409   ;;  %s140_s0 = smov [#allocation6]  }
   0x8   :  { %v42_v4 = vsel %vm34_vm1, %v33_v2, 0.0  ;;  %v36_v5 = vrot.slane %v35_v3, 4  ;;  %s67_s13 = sshll.u32 %s140_s0, 4  ;;  %s69_s16 = sshll.u32 %s161_s1, 4  ;;  %s68_s13 = int_to_ptr.vmem [resolvable:$true] %s67_s13  ;;  %s70_s16 = int_to_ptr.hbm [resolvable:$true] %s69_s16 }
   0x9   :  { %v43_v6 = vrot.slane %v42_v4, 4 }
   0xa   :  { %v37_v7 = vadd.f32 %v36_v5, %v35_v3 }
   0xb   :  { %v44_v8 = vadd.f32 %v43_v6, %v42_v4 }
   0xc   :  { %v38_v9 = vrot.slane %v37_v7, 2 }
   0xd   :  { %v45_v10 = vrot.slane %v44_v8, 2 }
   0xe   :  { %v39_v11 = vadd.f32 %v38_v9, %v37_v7  ;;  %v31_v15 = vld [vmem:[#allocation2] sm:$0x3] }
   0xf   :  { %v46_v12 = vadd.f32 %v45_v10, %v44_v8 }
  0x10   :  { %v40_v13 = vrot.slane %v39_v11, 1 }
  0x11   :  { %v47_v14 = vrot.slane %v46_v12, 1 }
  0x12   :  { %v41_v16 = vadd.f32 %v40_v13, %v39_v11 }
  0x13   :  { %v48_v17 = vadd.f32 %v47_v14, %v46_v12 }
  0x15   :  { %v52_v18 = vsel %vm51_vm2, %v48_v17, %v41_v16 }
  0x16   :  { %v54_v19 = vadd.f32 %v52_v18, %v31_v15 }
  0x18   :  { %56 = vst.msk [vmem:[#allocation2] sm:$0x3] %vm29_vm0, %v54_v19 }
  0x1f   :  { %v60_v20 = vld [vmem:[#allocation2] sm:$0x3] }
  0x20   :  { %61 = vst.msk [vmem:[#allocation6] sm:$0x3] %vm29_vm0, %v60_v20 }
  0x21   :  { %72 = dma.vmem_to_hbm [thread:$0]  %s68_s13, 32, %s70_s16, [#allocation5]  }
  0x22   :  { %134 = dma.done.wait [#allocation5], 32  }
  0x23   :  { %135 = vsyncadd [#allocation5], 4294967264 }
  0x24   :  { %77 = vsyncpa [#allocation4], 1 }
  0x25   :  { %78 = vsyncpa [#allocation5], 1 }

</bundles_post_ra>
